<compile_context>
chip_gen: v7x
topology: tpu7x:2x2x1
jax: 0.10.0
libtpu: 0.0.40
codegen_flags: <defaults>
</compile_context>

<pallas_src>
import functools
import math

import jax
import jax.numpy as jnp
from jax.experimental import pallas as pl
from jax.experimental.pallas import tpu as pltpu


# ---------------------------------------------------------------------------
# Kernel bodies
# ---------------------------------------------------------------------------
def _excite_gate(sums, w1, w2, inv_n):
    """sigmoid(relu(mean @ W1p) @ W2p) on packed / H-padded weights -> (1, W).

    sums: (1, W) f32 per-(packed)-channel sums; w1: (W, Hp); w2: (Hp, W).
    Broadcasting to 8 sublane rows keeps both tiny matmuls tile-aligned.
    """
    y = jnp.broadcast_to(sums * inv_n, (8, sums.shape[-1]))          # (8, W)
    h = jnp.maximum(
        jnp.dot(y, w1, preferred_element_type=jnp.float32), 0.0)     # (8, Hp)
    s = jax.nn.sigmoid(
        jnp.dot(h, w2, preferred_element_type=jnp.float32))          # (8, W)
    return s[0:1]                                                    # (1, W)


def _fused_kernel(x_ref, w1_ref, w2_ref, o_ref, *, inv_n):
    # x_ref/o_ref: (1, NP, W);  w1_ref: (W, Hp);  w2_ref: (Hp, W)
    sums = jnp.sum(x_ref[...].astype(jnp.float32), axis=1)           # (1, W)
    gate = _excite_gate(sums, w1_ref[...], w2_ref[...], inv_n)       # (1, W)
    gate = gate[None].astype(x_ref.dtype)                            # (1,1,W)
    o_ref[...] = (x_ref[...] * gate).astype(o_ref.dtype)


def _squeeze_kernel(x_ref, sum_ref):
    # x_ref: (1, TN, W); sum_ref: (1, 1, W) f32, resident across the N axis.
    @pl.when(pl.program_id(1) == 0)
    def _():
        sum_ref[...] = jnp.zeros_like(sum_ref)

    # f32 only inside the reduction; no full-tile f32 temporary kept live.
    sum_ref[...] += jnp.sum(x_ref[...].astype(jnp.float32), axis=1,
                            keepdims=True)


def _scale_excite_kernel(sum_ref, w1_ref, w2_ref, x_ref, o_ref, gate_ref, *,
                         inv_n):
    # sum_ref: (1,1,W) f32;  w1/w2: packed excite weights;  x/o: (1,TN,W)
    # gate_ref: (1,1,W) VMEM scratch in x.dtype (computed once per batch).
    @pl.when(pl.program_id(1) == 0)
    def _():
        gate = _excite_gate(sum_ref[0], w1_ref[...], w2_ref[...], inv_n)
        gate_ref[...] = gate[None].astype(gate_ref.dtype)

    o_ref[...] = (x_ref[...] * gate_ref[...]).astype(o_ref.dtype)


# ---------------------------------------------------------------------------
# Layout / tiling helpers
# ---------------------------------------------------------------------------
def _pick_layout(N, C):
    """Lane-dense packing: pack rows so the last dim W = pack*C is a multiple
    of 128.  Falls back to no packing only for pathological C."""
    if C % 128 == 0:
        return 1, C
    pack = math.lcm(C, 128) // C
    if pack <= 16:
        return pack, pack * C
    return 1, C      # padding overhead not worth it; stores stay lane-masked


def _sublane_rows(dtype):
    """Native sublane row packing: 8 for f32, 16 for bf16, 32 for int8/fp8."""
    return max(8, 32 // jnp.dtype(dtype).itemsize)


def _pick_tile_rows(np_rows, row_bytes, max_block_bytes, gran):
    """Return (tile_rows, padded_rows).

    tile_rows is a multiple of `gran` (or the full extent), one
    (1, tile_rows, W) block stays <= max_block_bytes, and padded_rows
    (>= np_rows) is a multiple of tile_rows (pad instead of blowing the
    VMEM budget when no aligned divisor exists)."""
    max_rows = max(gran, max_block_bytes // row_bytes)
    if np_rows <= max_rows:
        return np_rows, np_rows                     # single full-extent tile
    best = (max_rows // gran) * gran
    cand = best
    while cand >= gran:                             # aligned divisor: no pad
        if np_rows % cand == 0:
            return cand, np_rows
        cand -= gran
    padded = ((np_rows + best - 1) // best) * best  # no divisor: pad
    return best, padded


def _vmem_budget_bytes():
    """Chip-aware scoped-VMEM budget (v7x has 64 MiB, v5e/v6e 128 MiB)."""
    try:
        cap = int(pltpu.get_tpu_info().vmem_capacity_bytes)
    except Exception:
        cap = 64 << 20              # assume the smallest (v7x per-core VMEM)
    return min((cap * 3) // 4, 64 << 20)


# ---------------------------------------------------------------------------
# Wrapper
# ---------------------------------------------------------------------------
def se_layer(x, w1t, w2t, *, force_streaming=False, max_block_bytes=None,
             fused_slab_bytes=None, vmem_limit_bytes=None):
    """Squeeze-and-excitation over the sequence axis.

    x:   (B, N, C)
    w1t: (C, H) = W1.T   (nn.Linear(C, H, bias=False).weight.T)
    w2t: (H, C) = W2.T   (nn.Linear(H, C, bias=False).weight.T)
    """
    B, N, C = x.shape
    H = w1t.shape[1]
    assert w1t.shape == (C, H) and w2t.shape == (H, C)

    itemsize = jnp.dtype(x.dtype).itemsize
    vmem_limit = (_vmem_budget_bytes() if vmem_limit_bytes is None
                  else vmem_limit_bytes)
    if max_block_bytes is None:          # 2x in + 2x out double-buffered
        max_block_bytes = vmem_limit // 6
    if fused_slab_bytes is None:         # extra headroom for the f32 reduce
        fused_slab_bytes = vmem_limit // 8

    # ---- lane-dense packed layout -----------------------------------------
    pack, W = _pick_layout(N, C)
    np_rows = -(-N // pack)              # ceil(N / pack) packed rows needed
    inv_n = 1.0 / N                      # true N (zero padding is harmless)

    # Pre-tile the tiny excite weights into the packed layout and zero-pad H
    # up to a multiple of 8 (exact no-op through relu / matmul).
    Hp = max(8, ((H + 7) // 8) * 8)
    w1p = jnp.zeros((W, Hp), jnp.float32).at[:, :H].set(
        jnp.tile(w1t.astype(jnp.float32), (pack, 1)))
    w2p = jnp.zeros((Hp, W), jnp.float32).at[:H, :].set(
        jnp.tile(w2t.astype(jnp.float32), (1, pack)))

    slab_bytes = np_rows * W * itemsize
    use_fused = (not force_streaming) and slab_bytes <= fused_slab_bytes

    if use_fused:
        np_pad = np_rows
    else:
        tn, np_pad = _pick_tile_rows(np_rows, W * itemsize, max_block_bytes,
                                     _sublane_rows(x.dtype))

    n_total = np_pad * pack
    if n_total != N:                     # zero-pad; zeros don't perturb sums
        x = jnp.pad(x, ((0, 0), (0, n_total - N), (0, 0)))
    xp = x.reshape(B, np_pad, W)

    if use_fused:
        # ---- single fused pass: squeeze + excite MLP + scale --------------
        out_p = pl.pallas_call(
            functools.partial(_fused_kernel, inv_n=inv_n),
            out_shape=jax.ShapeDtypeStruct((B, np_pad, W), x.dtype),
            grid_spec=pltpu.PrefetchScalarGridSpec(
                num_scalar_prefetch=0,
                grid=(B,),
                in_specs=[
                    pl.BlockSpec((1, np_pad, W), lambda b: (b, 0, 0)),
                    pl.BlockSpec((W, Hp), lambda b: (0, 0)),
                    pl.BlockSpec((Hp, W), lambda b: (0, 0)),
                ],
                out_specs=pl.BlockSpec((1, np_pad, W), lambda b: (b, 0, 0)),
            ),
            compiler_params=pltpu.CompilerParams(
                dimension_semantics=("parallel",),
                vmem_limit_bytes=vmem_limit),
            cost_estimate=pl.CostEstimate(
                flops=2 * B * np_pad * W,
                transcendentals=B * C,
                bytes_accessed=2 * B * np_pad * W * itemsize),
        )(xp, w1p, w2p)
    else:
        grid = (B, np_pad // tn)

        # ---- phase 1: streamed per-channel sums ---------------------------
        sums_w = pl.pallas_call(
            _squeeze_kernel,
            out_shape=jax.ShapeDtypeStruct((B, 1, W), jnp.float32),
            grid_spec=pltpu.PrefetchScalarGridSpec(
                num_scalar_prefetch=0,
                grid=grid,
                in_specs=[pl.BlockSpec((1, tn, W), lambda b, n: (b, n, 0))],
                out_specs=pl.BlockSpec((1, 1, W), lambda b, n: (b, 0, 0)),
            ),
            compiler_params=pltpu.CompilerParams(
                dimension_semantics=("parallel", "arbitrary"),
                vmem_limit_bytes=vmem_limit),
            cost_estimate=pl.CostEstimate(
                flops=B * np_pad * W,
                transcendentals=0,
                bytes_accessed=B * np_pad * W * itemsize + B * W * 4),
        )(xp)

        # ---- phase 2: excite MLP (per-batch prologue) + streamed scale ----
        out_p = pl.pallas_call(
            functools.partial(_scale_excite_kernel, inv_n=inv_n),
            out_shape=jax.ShapeDtypeStruct((B, np_pad, W), x.dtype),
            grid_spec=pltpu.PrefetchScalarGridSpec(
                num_scalar_prefetch=0,
                grid=grid,
                in_specs=[
                    pl.BlockSpec((1, 1, W), lambda b, n: (b, 0, 0)),
                    pl.BlockSpec((W, Hp), lambda b, n: (0, 0)),
                    pl.BlockSpec((Hp, W), lambda b, n: (0, 0)),
                    pl.BlockSpec((1, tn, W), lambda b, n: (b, n, 0)),
                ],
                out_specs=pl.BlockSpec((1, tn, W), lambda b, n: (b, n, 0)),
                scratch_shapes=[pltpu.VMEM((1, 1, W), x.dtype)],
            ),
            compiler_params=pltpu.CompilerParams(
                dimension_semantics=("parallel", "arbitrary"),
                vmem_limit_bytes=vmem_limit),
            cost_estimate=pl.CostEstimate(
                flops=B * np_pad * W,
                transcendentals=B * C,
                bytes_accessed=2 * B * np_pad * W * itemsize + B * W * 4),
        )(sums_w, w1p, w2p, xp)

    out = out_p.reshape(B, n_total, C)
    if n_total != N:
        out = out[:, :N, :]
    return out


def se_layer_ref(x, w1t, w2t):
    """Pure-JAX reference mirroring the PyTorch module."""
    y = jnp.mean(x, axis=1)                        # (B, C)
    h = jnp.maximum(y @ w1t, 0.0)                  # (B, H)
    s = jax.nn.sigmoid(h @ w2t)                    # (B, C)
    return x * s[:, None, :]


if __name__ == "__main__":
    # Small shapes consistent with the module: channel=64, reduction=16 -> H=4
    B, N, C, reduction = 2, 8, 64, 16
    H = C // reduction

    key = jax.random.PRNGKey(0)
    kx, k1, k2 = jax.random.split(key, 3)

    x = jax.random.normal(kx, (B, N, C), dtype=jnp.float32)

    # Deterministic weights, same shapes as nn.Linear(C, H) / nn.Linear(H, C)
    # (no bias), stored transposed so the math is y @ W.T directly.
    w1 = jax.random.normal(k1, (H, C), dtype=jnp.float32) * (1.0 / jnp.sqrt(C))
    w2 = jax.random.normal(k2, (C, H), dtype=jnp.float32) * (1.0 / jnp.sqrt(H))
    w1t = w1.T   # (C, H)
    w2t = w2.T   # (H, C)

    # 1) Fused single-pass path (per-batch slab easily fits VMEM here).
    out = jax.block_until_ready(jax.jit(se_layer)(x, w1t, w2t))
    ref = se_layer_ref(x, w1t, w2t)
    assert out.shape == x.shape
    assert jnp.allclose(out, ref, atol=1e-5, rtol=1e-5), "fused path mismatch"

    # 2) Streaming two-phase fallback, forced onto a multi-tile grid, so the
    #    large-N code path is also compiled and checked.
    N2 = 64
    x2 = jax.random.normal(kx, (B, N2, C), dtype=jnp.float32)
    ref2 = se_layer_ref(x2, w1t, w2t)
    streaming_fn = jax.jit(lambda a, b, c: se_layer(
        a, b, c, force_streaming=True, max_block_bytes=8 * 1024))
    out2 = jax.block_until_ready(streaming_fn(x2, w1t, w2t))
    assert out2.shape == x2.shape
    assert jnp.allclose(out2, ref2, atol=1e-5, rtol=1e-5), \
        "streaming path mismatch"

    print("KERNEL_OK")
</pallas_src>

<mosaic_0001>
module attributes {stable_mosaic.version = 11 : i64} {
  func.func @_fused_kernel(%arg0: i32, %arg1: memref<1x4x128xf32, #tpu.memory_space<vmem>>, %arg2: memref<128x8xf32, #tpu.memory_space<vmem>>, %arg3: memref<8x128xf32, #tpu.memory_space<vmem>>, %arg4: memref<1x4x128xf32, #tpu.memory_space<vmem>>) attributes {dimension_semantics = [#tpu.dimension_semantics<parallel>], iteration_bounds = array<i64: 2>, scalar_prefetch = 0 : i64, scratch_operands = 0 : i64, tpu.core_type = #tpu.core_type<tc>, window_params = [{transform_indices = @transform_0, window_bounds = array<i64: 1, 4, 128>}, {pipeline_mode = #tpu.pipeline_mode<synchronous>, transform_indices = @transform_1, window_bounds = array<i64: 128, 8>}, {pipeline_mode = #tpu.pipeline_mode<synchronous>, transform_indices = @transform_2, window_bounds = array<i64: 8, 128>}, {transform_indices = @transform_3, window_bounds = array<i64: 1, 4, 128>}]} {
    %c0 = arith.constant 0 : index
    %c0_0 = arith.constant 0 : index
    %c0_1 = arith.constant 0 : index
    %0 = vector.load %arg1[%c0, %c0_0, %c0_1] : memref<1x4x128xf32, #tpu.memory_space<vmem>>, vector<1x4x128xf32>
    %cst = arith.constant dense<0.000000e+00> : vector<1x128xf32>
    %1 = vector.multi_reduction <add>, %0, %cst [1] : vector<1x4x128xf32> to vector<1x128xf32>
    %c0_2 = arith.constant 0 : index
    %c0_3 = arith.constant 0 : index
    %2 = vector.load %arg2[%c0_2, %c0_3] : memref<128x8xf32, #tpu.memory_space<vmem>>, vector<128x8xf32>
    %c0_4 = arith.constant 0 : index
    %c0_5 = arith.constant 0 : index
    %3 = vector.load %arg3[%c0_4, %c0_5] : memref<8x128xf32, #tpu.memory_space<vmem>>, vector<8x128xf32>
    %cst_6 = arith.constant 1.250000e-01 : f32
    %4 = vector.broadcast %cst_6 : f32 to vector<1x128xf32>
    %5 = arith.mulf %1, %4 : vector<1x128xf32>
    %6 = vector.shape_cast %5 : vector<1x128xf32> to vector<1x128xf32>
    %7 = vector.broadcast %6 : vector<1x128xf32> to vector<8x128xf32>
    %cst_7 = arith.constant dense<0.000000e+00> : vector<8x8xf32>
    %8 = tpu.matmul %7, %2, %cst_7 {dimension_numbers = #tpu.dot_dimension_numbers<[1], [0], [0], [1], [0, 0, 1, 1], [], []>} : vector<8x128xf32>, vector<128x8xf32>, vector<8x8xf32> -> vector<8x8xf32>
    %cst_8 = arith.constant 0.000000e+00 : f32
    %9 = vector.broadcast %cst_8 : f32 to vector<8x8xf32>
    %10 = arith.maximumf %8, %9 : vector<8x8xf32>
    %cst_9 = arith.constant dense<0.000000e+00> : vector<8x128xf32>
    %11 = tpu.matmul %10, %3, %cst_9 {dimension_numbers = #tpu.dot_dimension_numbers<[1], [0], [0], [1], [0, 0, 1, 1], [], []>} : vector<8x8xf32>, vector<8x128xf32>, vector<8x128xf32> -> vector<8x128xf32>
    %12 = arith.negf %11 : vector<8x128xf32>
    %13 = math.exp %12 : vector<8x128xf32>
    %cst_10 = arith.constant 1.000000e+00 : f32
    %14 = vector.broadcast %cst_10 : f32 to vector<8x128xf32>
    %15 = arith.addf %14, %13 : vector<8x128xf32>
    %16 = arith.divf %14, %15 : vector<8x128xf32>
    %17 = vector.extract_strided_slice %16 {offsets = [0, 0], sizes = [1, 128], strides = [1, 1]} : vector<8x128xf32> to vector<1x128xf32>
    %18 = vector.shape_cast %17 : vector<1x128xf32> to vector<1x1x128xf32>
    %c0_11 = arith.constant 0 : index
    %c0_12 = arith.constant 0 : index
    %c0_13 = arith.constant 0 : index
    %19 = vector.load %arg1[%c0_11, %c0_12, %c0_13] : memref<1x4x128xf32, #tpu.memory_space<vmem>>, vector<1x4x128xf32>
    %20 = vector.broadcast %18 : vector<1x1x128xf32> to vector<1x4x128xf32>
    %21 = arith.mulf %19, %20 : vector<1x4x128xf32>
    %c0_14 = arith.constant 0 : index
    %c0_15 = arith.constant 0 : index
    %c0_16 = arith.constant 0 : index
    %22 = vector.load %arg4[%c0_14, %c0_15, %c0_16] : memref<1x4x128xf32, #tpu.memory_space<vmem>>, vector<1x4x128xf32>
    tpu.vector_store %arg4[%c0_14, %c0_15, %c0_16], %21 {strides = array<i32>} : memref<1x4x128xf32, #tpu.memory_space<vmem>>, vector<1x4x128xf32>,
    return
  }
  func.func @transform_0(%arg0: i32) -> (i32, i32, i32) {
    %c0_i32 = arith.constant 0 : i32
    %c0_i32_0 = arith.constant 0 : i32
    %c0_i32_1 = arith.constant 0 : i32
    return %arg0, %c0_i32, %c0_i32_0 : i32, i32, i32
  }
  func.func @transform_1(%arg0: i32) -> (i32, i32) {
    %c0_i32 = arith.constant 0 : i32
    %c0_i32_0 = arith.constant 0 : i32
    %c0_i32_1 = arith.constant 0 : i32
    return %c0_i32, %c0_i32_0 : i32, i32
  }
  func.func @transform_2(%arg0: i32) -> (i32, i32) {
    %c0_i32 = arith.constant 0 : i32
    %c0_i32_0 = arith.constant 0 : i32
    %c0_i32_1 = arith.constant 0 : i32
    return %c0_i32, %c0_i32_0 : i32, i32
  }
  func.func @transform_3(%arg0: i32) -> (i32, i32, i32) {
    %c0_i32 = arith.constant 0 : i32
    %c0_i32_0 = arith.constant 0 : i32
    %c0_i32_1 = arith.constant 0 : i32
    return %arg0, %c0_i32, %c0_i32_0 : i32, i32, i32
  }
}

</mosaic_0001>

<bundles_post_ra>
// kernel: se_layer.1
= control target key start
LH: loop header
LB: loop body
LE: loop exit
PB: predicated region body
PF: predicated region fallthrough
CT: control target
= control target key end

     0   :  { %s543_s12 = smov 0   ;;  %s618_s0 = inlined_call_operand.vmem [shape: f32[2,4,128], index: 0, kind: input, shape index: {}]   ;;  %s619_s1 = inlined_call_operand.vmem [shape: f32[128,8], index: 1, kind: input, shape index: {}]   ;;  %s620_s2 = inlined_call_operand.vmem [shape: f32[8,128], index: 2, kind: input, shape index: {}]   ;;  %s621_s3 = inlined_call_operand.vmem [shape: f32[2,4,128], index: 3, kind: output, shape index: {}]  }
   0x1 LB: > { %s403_s13 = sadd.s32 4294967295, %s518_s12   ;;  %p407_p0 = scmp.ge.s32.totalorder %s518_s12, 1  ;;  %s518_s12 = sphi %s543_s12, %s13_s12  }
   0x2   : > { %p136_p1 = scmp.lt.s32.totalorder %s518_s12, 3 }
   0x4   : > { %p137_p2 = pnand %p407_p0, %p136_p1 }
   0x5   : > { %v175_v0 = vld [vmem:[%s619_s1] sm:$0xff] (!%p137_p2)  ;;  %v176_v1 = vld [vmem:[%s619_s1 + $0x8] sm:$0xff] (!%p137_p2)  ;;  %v177_v2 = vld [vmem:[%s619_s1 + $0x10] sm:$0xff] (!%p137_p2)  ;;  %v520_v3 = vmov (!%p137_p2), 0.0|0.0   ;;  %vm521_vm0 = vmmov (!%p137_p2), 0   ;;  %v522_v6 = vmov (!%p137_p2), 0.0   ;;  %v344_v44 = vlaneseq (!%p137_p2) }
   0x6   : > { %140 = sbr.rel (%p137_p2) target bundleno = 496 (0x1f0), region = 32  ;;  %473 = vmatprep.subr.bf16.mxu0 (!%p137_p2), %v520_v3  ;;  %v474_v4 = vpack.c.bf16 (!%p137_p2), %v176_v1, %v175_v0  ;;  %v178_v5 = vld [vmem:[%s619_s1 + $0x18] sm:$0xff] (!%p137_p2)  ;;  %465 = vmatprep.mubr.msk.f32.mxu0 (!%p137_p2), %vm521_vm0, %v522_v6  ;;  %p158_p3 = scmp.lt.s32.totalorder (!%p137_p2), %s403_s13, 1  ;;  %v179_v8 = vld [vmem:[%s619_s1 + $0x20] sm:$0xff] (!%p137_p2)  ;;  %v180_v9 = vld [vmem:[%s619_s1 + $0x28] sm:$0xff] (!%p137_p2)  ;;  %vm167_vm1 = vcmask (!%p137_p2), 1043456  }
   0x7   : > { %468 = vmatprep.subr.mxu1 (!%p137_p2), %v522_v6  ;;  %470 = vmatprep.mubr.msk.f32.mxu1 (!%p137_p2), %vm521_vm0, %v522_v6  ;;  %v477_v7 = vpack.c.bf16 (!%p137_p2), %v178_v5, %v177_v2  ;;  %v480_v10 = vpack.c.bf16 (!%p137_p2), %v180_v9, %v179_v8  ;;  %v181_v12 = vld [vmem:[%s619_s1 + $0x30] sm:$0xff] (!%p137_p2)  ;;  %v182_v13 = vld [vmem:[%s619_s1 + $0x38] sm:$0xff] (!%p137_p2)  ;;  %v183_v18 = vld [vmem:[%s619_s1 + $0x40] sm:$0xff] (!%p137_p2)  ;;  %vm264_vm2 = vcmask (!%p137_p2), 64512   ;;  %v345_v45 = vshrl.u32 (!%p137_p2), %v344_v44, 7 }
   0x8   : > { %475 = vmatpush3.bf16.msra.mxu0 (!%p137_p2), %v474_v4  ;;  %v483_v16 = vpack.c.bf16 (!%p137_p2), %v182_v13, %v181_v12  ;;  %v184_v19 = vld [vmem:[%s619_s1 + $0x48] sm:$0xff] (!%p137_p2)  ;;  %v185_v22 = vld [vmem:[%s619_s1 + $0x50] sm:$0xff] (!%p137_p2)  ;;  %v186_v23 = vld [vmem:[%s619_s1 + $0x58] sm:$0xff] (!%p137_p2) }
   0x9   : > { %476 = vmatprep.subr.bf16.mxu0 (!%p137_p2), %v520_v3  ;;  %v486_v21 = vpack.c.bf16 (!%p137_p2), %v184_v19, %v183_v18  ;;  %v489_v25 = vpack.c.bf16 (!%p137_p2), %v186_v23, %v185_v22  ;;  %v187_v26 = vld [vmem:[%s619_s1 + $0x60] sm:$0xff] (!%p137_p2)  ;;  %v188_v27 = vld [vmem:[%s619_s1 + $0x68] sm:$0xff] (!%p137_p2)  ;;  %v189_v30 = vld [vmem:[%s619_s1 + $0x70] sm:$0xff] (!%p137_p2)  ;;  %v346_v46 = vsub.s32 (!%p137_p2), 0, %v345_v45 }
   0xa   : > { %v492_v29 = vpack.c.bf16 (!%p137_p2), %v188_v27, %v187_v26  ;;  %v190_v31 = vld [vmem:[%s619_s1 + $0x78] sm:$0xff] (!%p137_p2)  ;;  %v191_v35 = vld [vmem:[%s620_s2] sm:$0xff] (!%p137_p2) }
   0xb   : > { %v495_v33 = vpack.c.bf16 (!%p137_p2), %v190_v31, %v189_v30  ;;  %469 = vmatpush3.msra.mxu1 (!%p137_p2), %v191_v35 }
   0xc   : > { %478 = vmatpush3.bf16.msra.mxu0 (!%p137_p2), %v477_v7 }
   0xd   : > { %s623_s13 = smov (!%p158_p3, %s403_s13), 1  ;;  %479 = vmatprep.subr.bf16.mxu0 %v520_v3 }
   0xe   : > { %s408_s26 = sshll.u32 %s623_s13, 2 }
   0xf   : > { %s161_s29 = scalar_lea.vmem %s618_s0, %s408_s26  ;;  %s165_s30 = scalar_lea.vmem %s621_s3, %s408_s26 }
  0x10   : > { %v166_v11 = vld [vmem:[%s161_s29] sm:$0xf]  ;;  %481 = vmatpush3.bf16.msra.mxu0 %v480_v10 }
  0x11   : > { %v168_v14 = vsel %vm167_vm1, %v166_v11, 0.0  ;;  %482 = vmatprep.subr.bf16.mxu0 %v520_v3 }
  0x12   : > { %v169_v15 = vrot.slane %v168_v14, 4 }
  0x14   : > { %v170_v17 = vadd.f32 %v169_v15, %v168_v14  ;;  %484 = vmatpush3.bf16.msra.mxu0 %v483_v16 }
  0x15   : > { %485 = vmatprep.subr.bf16.mxu0 %v520_v3 }
  0x16   : > { %v171_v20 = vrot.slane %v170_v17, 2 }
  0x18   : > { %v172_v24 = vadd.f32 %v171_v20, %v170_v17  ;;  %487 = vmatpush3.bf16.msra.mxu0 %v486_v21 }
  0x19   : > { %488 = vmatprep.subr.bf16.mxu0 %v520_v3 }
  0x1a   : > { %v173_v28 = vrot.slane %v172_v24, 1 }
  0x1c   : > { %490 = vmatpush3.bf16.msra.mxu0 %v489_v25  ;;  %v174_v32 = vadd.f32 %v173_v28, %v172_v24 }
  0x1d   : > { %491 = vmatprep.subr.bf16.mxu0 %v520_v3 }
  0x1e   : > { %v192_v34 = vmul.f32 0.125, %v174_v32 }
  0x20   : > { %493 = vmatpush3.bf16.msra.mxu0 %v492_v29 }
  0x21   : > { %494 = vmatprep.subr.bf16.mxu0 %v520_v3 }
  0x24   : > { %496 = vmatpush3.bf16.msra.mxu0 %v495_v33 }
  0x27   : > { %466 = vmatmul.mubr.f32.vlgmr.msra.gmra.mrb[0].mxu0 %v192_v34 }
  0xfa   : > { %v259_v36 = vpop.f32.mrb[0].mxu0 }
  0xfb   : > { %v263_v37 = vmax.f32 %v259_v36, 0.0  ;;  %v467_v38 = vpop.f32.mrb[1].mxu0 }
  0xfd   : > { %471 = vmatmul.mubr.msk.f32.vlgmr.msra.gmra.mrb[0].mxu1 %vm264_vm2, %v263_v37 }
 0x1d0   : > { %v334_v39 = vpop.f32.mrb[0].mxu1 }
 0x1d1   : > { %v411_v40 = vmul.f32 -1.442695, %v334_v39  ;;  %v472_v41 = vpop.f32.mrb[1].mxu1 }
 0x1d3   : > { %508 = vpow2.f32 %v411_v40 }
 0x1dd   : > { %v509_v42 = vpop.eup %508 }
 0x1de   : > { %v341_v43 = vadd.f32 1.0, %v509_v42 }
 0x1e0   : > { %510 = vrcp.f32 %v341_v43 }
 0x1ea   : > { %v511_v47 = vpop.eup %510 }
 0x1eb   : > { %v347_v48 = vrot.slane %v511_v47, %v346_v46 }
 0x1ed   : > { %v348_v49 = vmul.f32 %v347_v48, %v166_v11 }
 0x1ef   : > { %349 = vst [vmem:[%s165_s30] sm:$0xf] %v348_v49 }
 0x1f0 PF: > { %s13_s12 = sadd.s32 1, %s518_s12  }
 0x1f1   : > { %p10_p4 = scmp.ge.s32.totalorder %s13_s12, 4  }
 0x1f3   :  { %12 = sbr.rel (!%p10_p4) target bundleno = 1 (0x1), region = 62 }

</bundles_post_ra>
